<compile_context>
chip_gen: v6e
topology: v6e:2x2x1
jax: 0.10.0
libtpu: 0.0.40
codegen_flags: <defaults>
</compile_context>

<pallas_src>
import functools

import jax
import jax.numpy as jnp
from jax.experimental import pallas as pl
from jax.experimental.pallas import tpu as pltpu


def _round_up(v, m):
    return ((v + m - 1) // m) * m


def _vmem_capacity_bytes():
    """Generation-aware VMEM capacity (64 MiB/TC on v7x, 128 MiB on v5e/v6e)."""
    try:
        cap = getattr(pltpu.get_tpu_info(), "vmem_capacity_bytes", None)
        if cap:
            return int(cap)
    except Exception:
        pass
    return 64 << 20  # conservative default (v7x per-TensorCore)


def _hermite_kernel(x_ref, w_ref, o_ref, *, degree, input_dim, fuse, mxu_dtype):
    # x_ref: (tm, input_dim) row tile of the flattened input
    # w_ref: ((degree+1)*input_dim, tn) fused coefficients (row k = d*input_dim + i)
    # o_ref: (tm, tn)
    x = jnp.tanh(x_ref[...].astype(jnp.float32))

    # Physicists' Hermite recurrence: H_0 = 1, H_1 = 2x,
    # H_i = 2x*H_{i-1} - 2(i-1)*H_{i-2}.  two_x is reused (VALU-slot relief).
    hs = [jnp.ones_like(x)]
    if degree >= 1:
        two_x = 2.0 * x
        hs.append(two_x)
        for i in range(2, degree + 1):
            hs.append(two_x * hs[-1] - (2.0 * (i - 1)) * hs[-2])

    if fuse:
        # Small fused K: one MXU matmul over the concatenated basis.
        h = jnp.concatenate(hs, axis=-1)  # (tm, (degree+1)*input_dim)
        acc = jnp.dot(h.astype(mxu_dtype), w_ref[...].astype(mxu_dtype),
                      preferred_element_type=jnp.float32)
    else:
        # Large K: accumulate per degree; static ref slices are zero-cost views and
        # only ~3 Hermite terms stay live (no big concat intermediate / relayouts).
        acc = None
        for d, hd in enumerate(hs):
            w_d = w_ref[pl.ds(d * input_dim, input_dim), :]
            term = jnp.dot(hd.astype(mxu_dtype), w_d.astype(mxu_dtype),
                           preferred_element_type=jnp.float32)
            acc = term if acc is None else acc + term

    o_ref[...] = acc.astype(o_ref.dtype)


def hermite_forward(x, hermite_coeffs, degree, *, block_rows=1024,
                    mxu_dtype=jnp.float32):
    """x: (a, b, c) with a*b*c divisible by input_dim;
    hermite_coeffs: (input_dim, output_dim, degree+1)."""
    a, b, c = x.shape
    input_dim, output_dim, deg_p1 = hermite_coeffs.shape
    assert deg_p1 == degree + 1
    assert (a * b * c) % input_dim == 0

    x_flat = jnp.reshape(x, (-1, input_dim))
    n = x_flat.shape[0]
    fused_k = (degree + 1) * input_dim
    vmem_cap = _vmem_capacity_bytes()

    # --- Output (lane) tiling: only when the resident W block would pressure VMEM
    #     (matters on v7x's 64 MiB).  Otherwise one full-width block -> exact-width
    #     store, no lane padding and no post-kernel slice / extra HBM pass.
    col_tile = 1024
    if output_dim > 2 * col_tile and fused_k * output_dim * 4 > vmem_cap // 4:
        tn = col_tile
    else:
        tn = output_dim
    out_pad = _round_up(output_dim, tn)
    n_col = out_pad // tn
    w_buffers = 1 if n_col == 1 else 2

    # --- Row tiling: big tiles (kernel is HBM/overhead-bound for small dims), but aim
    #     for >=2 row blocks so "parallel" shards across v7x's two TensorCores.
    tm = max(8, min(block_rows, _round_up(-(-n // 2), 8)))

    def _vmem_need(tm_):
        return 4 * (2 * tm_ * input_dim        # x tiles (double buffered)
                    + 2 * tm_ * tn             # out tiles (double buffered)
                    + w_buffers * fused_k * tn  # coefficients
                    + tm_ * fused_k)           # Hermite basis / live terms

    while _vmem_need(tm) > (vmem_cap * 3) // 5 and tm > 8:
        tm = max(8, ((tm // 2) // 8) * 8)

    n_pad = _round_up(n, tm)
    if n_pad != n:
        x_flat = jnp.pad(x_flat, ((0, n_pad - n), (0, 0)))
    grid = (n_pad // tm, n_col)

    # --- Fused coefficient layout: row k = d*input_dim + i matches the kernel's
    #     [H_0 | H_1 | ... | H_deg] ordering, so H @ W == einsum('bid,iod->bo').
    w2d = jnp.transpose(hermite_coeffs, (2, 0, 1)).reshape(fused_k, output_dim)
    w2d = w2d.astype(jnp.float32)
    if out_pad != output_dim:
        w2d = jnp.pad(w2d, ((0, 0), (0, out_pad - output_dim)))
    # TODO(synk): optionally feed the MXU bf16 (cast H and W) on v6e/v7x for ~3x MXU
    # throughput; kept f32 here because the tiny coefficient scale
    # (std = 1/(input_dim*(degree+1))) would not meet the 1e-4 tolerance in bf16.

    vmem_limit = int(min(max(2 * _vmem_need(tm) + (4 << 20), 32 << 20),
                         (vmem_cap * 3) // 4))

    fuse = fused_k <= 512  # small K: one fused matmul beats per-degree accumulation
    kernel = functools.partial(_hermite_kernel, degree=degree, input_dim=input_dim,
                               fuse=fuse, mxu_dtype=mxu_dtype)

    def _run(single_buffer_w):
        if n_col == 1:
            if single_buffer_w:
                # W's index_map is constant across the grid: a second buffer gives zero
                # pipelining benefit and just burns VMEM.
                w_spec = pl.BlockSpec((fused_k, tn), lambda i, j: (0, 0),
                                      pipeline_mode=pl.Buffered(1))
            else:
                w_spec = pl.BlockSpec((fused_k, tn), lambda i, j: (0, 0))
        else:
            w_spec = pl.BlockSpec((fused_k, tn), lambda i, j: (0, j))
        return pl.pallas_call(
            kernel,
            out_shape=jax.ShapeDtypeStruct((n_pad, out_pad), x.dtype),
            grid_spec=pltpu.PrefetchScalarGridSpec(
                num_scalar_prefetch=0,
                grid=grid,
                in_specs=[pl.BlockSpec((tm, input_dim), lambda i, j: (i, 0)),
                          w_spec],
                out_specs=pl.BlockSpec((tm, tn), lambda i, j: (i, j)),
            ),
            compiler_params=pltpu.CompilerParams(
                dimension_semantics=("parallel", "arbitrary"),
                vmem_limit_bytes=vmem_limit),
        )(x_flat, w2d)

    try:
        out_flat = _run(single_buffer_w=True)
    except Exception:
        # Fallback if this JAX version rejects pipeline_mode / pl.Buffered(1).
        out_flat = _run(single_buffer_w=False)

    if n_pad != n:
        out_flat = out_flat[:n]
    if out_pad != output_dim:
        out_flat = out_flat[:, :output_dim]
    return jnp.reshape(out_flat, (a, b, output_dim))


def hermite_reference(x, hermite_coeffs, degree):
    """Pure-JAX reference mirroring the PyTorch forward exactly."""
    a, b, c = x.shape
    input_dim, output_dim, _ = hermite_coeffs.shape
    xf = jnp.tanh(jnp.reshape(x, (-1, input_dim)).astype(jnp.float32))
    hs = [jnp.ones_like(xf)]
    if degree > 0:
        hs.append(2.0 * xf)
    for i in range(2, degree + 1):
        hs.append(2.0 * xf * hs[i - 1] - 2.0 * (i - 1) * hs[i - 2])
    hermite = jnp.stack(hs, axis=-1)  # (N, input_dim, degree+1)
    y = jnp.einsum('bid,iod->bo', hermite, hermite_coeffs.astype(jnp.float32))
    return jnp.reshape(y, (a, b, output_dim)).astype(x.dtype)


if __name__ == "__main__":
    # Small shapes consistent with the module's forward: x is (a, b, input_dim).
    a, b = 2, 8
    input_dim, output_dim, degree = 16, 32, 3

    key = jax.random.PRNGKey(0)
    k_x, k_w = jax.random.split(key)

    x = jax.random.normal(k_x, (a, b, input_dim), dtype=jnp.float32)

    # Deterministic init matching nn.init.normal_(mean=0, std=1/(input_dim*(degree+1))).
    std = 1.0 / (input_dim * (degree + 1))
    hermite_coeffs = std * jax.random.normal(
        k_w, (input_dim, output_dim, degree + 1), dtype=jnp.float32)

    y = jax.block_until_ready(hermite_forward(x, hermite_coeffs, degree))
    y_ref = hermite_reference(x, hermite_coeffs, degree)

    assert y.shape == (a, b, output_dim)
    assert jnp.allclose(y, y_ref, atol=1e-4, rtol=1e-4)

    print("KERNEL_OK")
</pallas_src>

<mosaic_0001>
module attributes {stable_mosaic.version = 11 : i64} {
  func.func @_hermite_kernel(%arg0: i32, %arg1: i32, %arg2: memref<8x16xf32, #tpu.memory_space<vmem>>, %arg3: memref<64x32xf32, #tpu.memory_space<vmem>>, %arg4: memref<8x32xf32, #tpu.memory_space<vmem>>) attributes {dimension_semantics = [#tpu.dimension_semantics<parallel>, #tpu.dimension_semantics<arbitrary>], iteration_bounds = array<i64: 2, 1>, scalar_prefetch = 0 : i64, scratch_operands = 0 : i64, tpu.core_type = #tpu.core_type<tc>, window_params = [{transform_indices = @transform_0, window_bounds = array<i64: 8, 16>}, {pipeline_mode = #tpu.pipeline_mode<synchronous>, transform_indices = @transform_1, window_bounds = array<i64: 64, 32>}, {transform_indices = @transform_2, window_bounds = array<i64: 8, 32>}]} {
    %c0 = arith.constant 0 : index
    %c0_0 = arith.constant 0 : index
    %0 = vector.load %arg2[%c0, %c0_0] : memref<8x16xf32, #tpu.memory_space<vmem>>, vector<8x16xf32>
    %1 = math.tanh %0 : vector<8x16xf32>
    %cst = arith.constant 1.000000e+00 : f32
    %2 = vector.broadcast %cst : f32 to vector<8x16xf32>
    %cst_1 = arith.constant 2.000000e+00 : f32
    %3 = vector.broadcast %cst_1 : f32 to vector<8x16xf32>
    %4 = arith.mulf %3, %1 : vector<8x16xf32>
    %5 = arith.mulf %4, %4 : vector<8x16xf32>
    %cst_2 = arith.constant 2.000000e+00 : f32
    %6 = vector.broadcast %cst_2 : f32 to vector<8x16xf32>
    %7 = arith.mulf %6, %2 : vector<8x16xf32>
    %8 = arith.subf %5, %7 : vector<8x16xf32>
    %9 = arith.mulf %4, %8 : vector<8x16xf32>
    %cst_3 = arith.constant 4.000000e+00 : f32
    %10 = vector.broadcast %cst_3 : f32 to vector<8x16xf32>
    %11 = arith.mulf %10, %4 : vector<8x16xf32>
    %12 = arith.subf %9, %11 : vector<8x16xf32>
    %13 = tpu.concatenate %2, %4, %8, %12 in 1 : vector<8x16xf32>, vector<8x16xf32>, vector<8x16xf32>, vector<8x16xf32> -> vector<8x64xf32>
    %c0_4 = arith.constant 0 : index
    %c0_5 = arith.constant 0 : index
    %14 = vector.load %arg3[%c0_4, %c0_5] : memref<64x32xf32, #tpu.memory_space<vmem>>, vector<64x32xf32>
    %cst_6 = arith.constant dense<0.000000e+00> : vector<8x32xf32>
    %15 = tpu.matmul %13, %14, %cst_6 {dimension_numbers = #tpu.dot_dimension_numbers<[1], [0], [0], [1], [0, 0, 1, 1], [], []>} : vector<8x64xf32>, vector<64x32xf32>, vector<8x32xf32> -> vector<8x32xf32>
    %c0_7 = arith.constant 0 : index
    %c0_8 = arith.constant 0 : index
    %16 = vector.load %arg4[%c0_7, %c0_8] : memref<8x32xf32, #tpu.memory_space<vmem>>, vector<8x32xf32>
    tpu.vector_store %arg4[%c0_7, %c0_8], %15 {strides = array<i32>} : memref<8x32xf32, #tpu.memory_space<vmem>>, vector<8x32xf32>,
    return
  }
  func.func @transform_0(%arg0: i32, %arg1: i32) -> (i32, i32) {
    %c0_i32 = arith.constant 0 : i32
    %c0_i32_0 = arith.constant 0 : i32
    return %arg0, %c0_i32 : i32, i32
  }
  func.func @transform_1(%arg0: i32, %arg1: i32) -> (i32, i32) {
    %c0_i32 = arith.constant 0 : i32
    %c0_i32_0 = arith.constant 0 : i32
    %c0_i32_1 = arith.constant 0 : i32
    return %c0_i32, %c0_i32_0 : i32, i32
  }
  func.func @transform_2(%arg0: i32, %arg1: i32) -> (i32, i32) {
    %c0_i32 = arith.constant 0 : i32
    return %arg0, %arg1 : i32, i32
  }
}

module attributes {stable_mosaic.version = 11 : i64} {
  func.func @_hermite_kernel(%arg0: i32, %arg1: i32, %arg2: memref<8x16xf32, #tpu.memory_space<vmem>>, %arg3: memref<64x32xf32, #tpu.memory_space<vmem>>, %arg4: memref<8x32xf32, #tpu.memory_space<vmem>>) attributes {dimension_semantics = [#tpu.dimension_semantics<parallel>, #tpu.dimension_semantics<arbitrary>], iteration_bounds = array<i64: 2, 1>, scalar_prefetch = 0 : i64, scratch_operands = 0 : i64, tpu.core_type = #tpu.core_type<tc>, window_params = [{transform_indices = @transform_0, window_bounds = array<i64: 8, 16>}, {pipeline_mode = #tpu.pipeline_mode<synchronous>, transform_indices = @transform_1, window_bounds = array<i64: 64, 32>}, {transform_indices = @transform_2, window_bounds = array<i64: 8, 32>}]} {
    %c0 = arith.constant 0 : index
    %c0_0 = arith.constant 0 : index
    %0 = vector.load %arg2[%c0, %c0_0] : memref<8x16xf32, #tpu.memory_space<vmem>>, vector<8x16xf32>
    %1 = math.tanh %0 : vector<8x16xf32>
    %cst = arith.constant 1.000000e+00 : f32
    %2 = vector.broadcast %cst : f32 to vector<8x16xf32>
    %cst_1 = arith.constant 2.000000e+00 : f32
    %3 = vector.broadcast %cst_1 : f32 to vector<8x16xf32>
    %4 = arith.mulf %3, %1 : vector<8x16xf32>
    %5 = arith.mulf %4, %4 : vector<8x16xf32>
    %cst_2 = arith.constant 2.000000e+00 : f32
    %6 = vector.broadcast %cst_2 : f32 to vector<8x16xf32>
    %7 = arith.mulf %6, %2 : vector<8x16xf32>
    %8 = arith.subf %5, %7 : vector<8x16xf32>
    %9 = arith.mulf %4, %8 : vector<8x16xf32>
    %cst_3 = arith.constant 4.000000e+00 : f32
    %10 = vector.broadcast %cst_3 : f32 to vector<8x16xf32>
    %11 = arith.mulf %10, %4 : vector<8x16xf32>
    %12 = arith.subf %9, %11 : vector<8x16xf32>
    %13 = tpu.concatenate %2, %4, %8, %12 in 1 : vector<8x16xf32>, vector<8x16xf32>, vector<8x16xf32>, vector<8x16xf32> -> vector<8x64xf32>
    %c0_4 = arith.constant 0 : index
    %c0_5 = arith.constant 0 : index
    %14 = vector.load %arg3[%c0_4, %c0_5] : memref<64x32xf32, #tpu.memory_space<vmem>>, vector<64x32xf32>
    %cst_6 = arith.constant dense<0.000000e+00> : vector<8x32xf32>
    %15 = tpu.matmul %13, %14, %cst_6 {dimension_numbers = #tpu.dot_dimension_numbers<[1], [0], [0], [1], [0, 0, 1, 1], [], []>} : vector<8x64xf32>, vector<64x32xf32>, vector<8x32xf32> -> vector<8x32xf32>
    %c0_7 = arith.constant 0 : index
    %c0_8 = arith.constant 0 : index
    %16 = vector.load %arg4[%c0_7, %c0_8] : memref<8x32xf32, #tpu.memory_space<vmem>>, vector<8x32xf32>
    tpu.vector_store %arg4[%c0_7, %c0_8], %15 {strides = array<i32>} : memref<8x32xf32, #tpu.memory_space<vmem>>, vector<8x32xf32>,
    return
  }
  func.func @transform_0(%arg0: i32, %arg1: i32) -> (i32, i32) {
    %c0_i32 = arith.constant 0 : i32
    %c0_i32_0 = arith.constant 0 : i32
    return %arg0, %c0_i32 : i32, i32
  }
  func.func @transform_1(%arg0: i32, %arg1: i32) -> (i32, i32) {
    %c0_i32 = arith.constant 0 : i32
    %c0_i32_0 = arith.constant 0 : i32
    %c0_i32_1 = arith.constant 0 : i32
    return %c0_i32, %c0_i32_0 : i32, i32
  }
  func.func @transform_2(%arg0: i32, %arg1: i32) -> (i32, i32) {
    %c0_i32 = arith.constant 0 : i32
    return %arg0, %arg1 : i32, i32
  }
}

</mosaic_0001>

<bundles_post_ra>
// kernel: tpu_custom_call.1
= control target key start
LH: loop header
LB: loop body
LE: loop exit
PB: predicated region body
PF: predicated region fallthrough
CT: control target
= control target key end

     0   :  { %7 = vsyncpa [#allocation3], 0  ;;  %s684_s0 = inlined_call_operand.vmem [shape: f32[16,16], index: 0, kind: input, shape index: {}]   ;;  %s685_s1 = inlined_call_operand.vmem [shape: f32[64,32], index: 1, kind: input, shape index: {}]   ;;  %s686_s2 = inlined_call_operand.hbm [shape: f32[16,32], index: 2, kind: output, shape index: {}]  }
   0x1   :  { %9 = vsyncpa [#allocation3 + $0x1], 0  ;;  %s547_s9 = smov 0   ;;  %s549_s10 = smov 0  }
   0x2   :  { %s551_s11 = smov 0   ;;  %s553_s12 = smov 0  }
   0x3   :  { %s555_s13 = smov 0   ;;  %s557_s14 = smov 0  }
   0x4 LB: > { %s345_s15 = sadd.s32 4294967295, %s524_s14   ;;  %s346_s16 = sadd.s32 4294967294, %s524_s14   ;;  %s524_s14 = sphi %s557_s14, %s15_s14   ;;  %s520_s13 = sphi %s555_s13, %s693_s13   ;;  %s516_s12 = sphi %s553_s12, %s692_s12   ;;  %s512_s11 = sphi %s551_s11, %s691_s11   ;;  %s508_s10 = sphi %s549_s10, %s690_s10   ;;  %s504_s9 = sphi %s547_s9, %s689_s9  }
   0x5   : > { %s27_s17 = sadd.s32 1, %s520_s13  ;;  %s83_s18 = sadd.s32 1, %s512_s11 }
   0x6   : > { %p29_p0 = scmp.ge.s32.totalorder %s27_s17, 2  ;;  %p93_p1 = scmp.ne.s32.totalorder %s512_s11, %s508_s10 }
   0x7   : > { %p94_p2 = scmp.eq.s32.totalorder %s345_s15, 1  ;;  %p99_p3 = scmp.ne.s32.totalorder %s508_s10, %s504_s9 }
   0x8   : > { %s695_s17 = smov (%p29_p0, %s27_s17), 0  ;;  %p100_p5 = scmp.eq.s32.totalorder %s346_s16, 1 }
   0x9   : > { %p587_p4 = por %p94_p2, %p93_p1  ;;  %s78_s20 = ssub.s32 %s520_s13, %s695_s17 }
   0xa   : > { %p349_p6 = scmp.ge.s32.totalorder %s524_s14, 1  ;;  %p81_p7 = scmp.eq.s32.totalorder %s78_s20, 0 }
   0xb   : > { %p594_p8 = por %p100_p5, %p99_p3  ;;  %p128_p9 = scmp.lt.s32.totalorder %s524_s14, 3 }
   0xc   : > { %s600_s22 = scalar_select %p81_p7, %s512_s11, %s83_s18  }
   0xd   : > { %p129_p10 = pnand %p349_p6, %p128_p9 }
   0xe   : > { %p149_p11 = scmp.lt.s32.totalorder (!%p129_p10), %s516_s12, 1  ;;  %s528_s26 = smov (!%p129_p10), 16  }
   0xf   : > { %132 = sbr.rel (%p129_p10) target bundleno = 372 (0x174), region = 28  ;;  %s530_s28 = smov (!%p129_p10), 48  }
  0x10   : > { %s146_s29 = sand.u32 (!%p129_p10), 1, %s508_s10   ;;  %s355_s3 = sshll.u32 (!%p129_p10), %s516_s12, 7 }
  0x11   : > { %s637_s8 = scalar_lea.hbm (!%p129_p10), %s686_s2, %s355_s3  ;;  %s263_s15 = scalar_lea.sflag (!%p129_p10), [#allocation3], %s146_s29 }
  0x14   : > { %v186_v0 = vld [vmem:[%s685_s1 + $0x38] sm:$0xff]  ;;  %v526_v1 = vmov 0.0   ;;  %v185_v2 = vld [vmem:[%s685_s1 + $0x30] sm:$0xff]  ;;  %s150_s27 = scalar_select %p149_p11, %s516_s12, 1  ;;  %v184_v3 = vld [vmem:[%s685_s1 + $0x28] sm:$0xff]  ;;  %vm527_vm0 = vmmov 0  }
  0x15   : > { %367 = vmatprep.subr.mxu0 %v526_v1  ;;  %v183_v5 = vld [vmem:[%s685_s1 + $0x20] sm:$0xff]  ;;  %v182_v6 = vld [vmem:[%s685_s1 + $0x18] sm:$0xff]  ;;  %v181_v7 = vld [vmem:[%s685_s1 + $0x10] sm:$0xff]  ;;  %383 = vmatprep.mubr.msk.f32.mxu0 %vm527_vm0, %v526_v1  ;;  %vm173_vm1 = vcmask 130048   ;;  %vm175_vm2 = vcmask 261120   ;;  %vm177_vm3 = vcmask 392192  }
  0x16   : > { %368 = vmatpush3.msra.mxu0 %v186_v0  ;;  %s351_s30 = sshll.u32 %s150_s27, 3  ;;  %v180_v8 = vld [vmem:[%s685_s1 + $0x8] sm:$0xff]  ;;  %v179_v9 = vld [vmem:[%s685_s1] sm:$0xff]  ;;  %s529_s27 = smov 32   ;;  %vm187_vm4 = vcmask 523264  }
  0x17   : > { %369 = vmatprep.subr.mxu0 %v526_v1  ;;  %s152_s5 = scalar_lea.vmem %s684_s0, %s351_s30  ;;  %s350_s30 = sshll.u32 %s146_s29, 3 }
  0x18   : > { %370 = vmatpush3.msra.mxu0 %v185_v2  ;;  %v153_v4 = vld [vmem:[%s152_s5] sm:$0xff]  ;;  %s148_s4 = scalar_lea.vmem [#allocation2], %s350_s30  ;;  %s531_s12 = smov [#allocation2]  }
  0x19   : > { %371 = vmatprep.subr.mxu0 %v526_v1  ;;  %446 = vtanh.f32 %v153_v4  ;;  %s277_s5 = sshll.u32 %s148_s4, 4  ;;  %s452_s18 = sshll.u32 %s531_s12, 4  ;;  %s639_s5 = int_to_ptr.vmem [resolvable:$true] %s277_s5  ;;  %s453_s18 = int_to_ptr.vmem [resolvable:$false] %s452_s18 }
  0x1a   : > { %372 = vmatpush3.msra.mxu0 %v184_v3  ;;  %s448_s16 = scalar_lea.vmem %s639_s5, 128  ;;  %s454_s20 = scalar_lea.vmem %s453_s18, 256 }
  0x1b   : > { %373 = vmatprep.subr.mxu0 %v526_v1  ;;  %p449_p12 = scmp.ne.s32.totalorder %s639_s5, %s448_s16  ;;  %p455_p1 = scmp.lt.s32.totalorder %s639_s5, %s453_s18 }
  0x1c   : > { %374 = vmatpush3.msra.mxu0 %v183_v5  ;;  %p456_p2 = scmp.lt.s32.totalorder %s454_s20, %s448_s16 }
  0x1d   : > { %375 = vmatprep.subr.mxu0 %v526_v1  ;;  %p450_p13 = pnand %p449_p12, %p587_p4 }
  0x1e   : > { %376 = vmatpush3.msra.mxu0 %v182_v6  ;;  %p457_p3 = por %p456_p2, %p455_p1 }
  0x1f   : > { %377 = vmatprep.subr.mxu0 %v526_v1  ;;  %p451_p0 = pneg %p450_p13 }
  0x20   : > { %378 = vmatpush3.msra.mxu0 %v181_v7 }
  0x21   : > { %379 = vmatprep.subr.mxu0 %v526_v1  ;;  %p458_p5 = pnand %p457_p3, %p451_p0 }
  0x22   : > { %380 = vmatpush3.msra.mxu0 %v180_v8 }
  0x23   : > { %381 = vmatprep.subr.mxu0 %v526_v1 }
  0x24   : > { %382 = vmatpush3.msra.mxu0 %v179_v9 }
  0x26   : > { %v447_v10 = vpop.eup %446 }
  0x27   : > { %v155_v11 = vmul.f32 2.0, %v447_v10 }
  0x29   : > { %162 = vrot.lane.b32.xlu0 %v155_v11, %s528_s26  ;;  %v156_v12 = vmul.f32 %v155_v11, %v155_v11  ;;  %v159_v14 = vmul.f32 4.0, %v155_v11 }
  0x2b   : > { %v352_v13 = vadd.f32 -2.0, %v156_v12 }
  0x2d   : > { %166 = vrot.lane.b32.xlu0 %v352_v13, %s529_s27  ;;  %v158_v15 = vmul.f32 %v352_v13, %v155_v11 }
  0x2f   : > { %v160_v16 = vsub.f32 %v158_v15, %v159_v14 }
  0x31   : > { %170 = vrot.lane.b32.xlu1 %v160_v16, %s530_s28 }
  0x9b   : > { %v163_v17 = vpop.permute.xlu0 %162 }
  0x9c   : > { %v174_v18 = vsel %vm173_vm1, 1.0, %v163_v17 }
  0x9f   : > { %v167_v19 = vpop.permute.xlu0 %166 }
  0xa0   : > { %v176_v20 = vsel %vm175_vm2, %v174_v18, %v167_v19 }
  0xa3   : > { %v171_v21 = vpop.permute.xlu1 %170 }
  0xa4   : > { %v178_v22 = vsel %vm177_vm3, %v176_v20, %v171_v21 }
  0xa5   : > { %384 = vmatmul.mubr.msk.f32.vlgmr.msra.gmra.mxu0 %vm187_vm4, %v178_v22 }
 0x165   : > { %v257_v23 = vpop.f32.mrf.mxu0 }
 0x166   : > { %261 = vst.msk [vmem:[%s148_s4] sm:$0xff] %vm175_vm2, %v257_v23 }
 0x167   : > { %v385_v24 = vpop.f32.mrf.mxu0 }
 0x168   : > { %461 = shalt.err (!%p458_p5)
}
 0x169   : > { %s462_s23 = scalar_lea.hbm %s637_s8, 128  ;;  %s466_s26 = scalar_lea.hbm %s686_s2, 256 }
 0x16a   : > { %p463_p6 = scmp.ne.s32.totalorder %s637_s8, %s462_s23  ;;  %p467_p10 = scmp.lt.s32.totalorder %s637_s8, %s686_s2 }
 0x16b   : > { %p468_p11 = scmp.lt.s32.totalorder %s466_s26, %s462_s23 }
 0x16c   : > { %p464_p7 = pnand %p463_p6, %p587_p4 }
 0x16d   : > { %p469_p12 = por %p468_p11, %p467_p10 }
 0x16e   : > { %p465_p9 = pneg %p464_p7 }
 0x170   : > { %p470_p13 = pnand %p469_p12, %p465_p9 }
 0x172   : > { %473 = shalt.err (!%p470_p13)
}
 0x173   : > { %386 = dma.vmem_to_hbm [thread:$0]  (%p587_p4), %s639_s5, 128, %s637_s8, %s263_s15  }
 0x174 PF: > { %p392_p0 = scmp.ge.s32.totalorder %s524_s14, 2  ;;  %s289_s29 = sand.u32 1, %s504_s9  }
 0x175   : > { %s290_s30 = scalar_lea.sflag [#allocation3], %s289_s29 }
 0x176   : > { %p389_p1 = pnand %p392_p0, %p594_p8 }
 0x178   : > { %p390_p2 = pneg %p389_p1 }
 0x17a   : > { %499 = dma.done.wait (%p390_p2), %s290_s30, 128  }
 0x17b   : > { %501 = vsyncadd (%p390_p2), %s290_s30, 4294967168  ;;  %s15_s14 = sadd.s32 1, %s524_s14   ;;  %s689_s9 = smov %s508_s10 }
 0x17c   : > { %p12_p3 = scmp.ge.s32.totalorder %s15_s14, 4   ;;  %s690_s10 = smov %s512_s11 }
 0x17d   : > { %s691_s11 = smov %s600_s22  ;;  %s692_s12 = smov %s520_s13 }
 0x17e   : > { %s693_s13 = smov %s695_s17  ;;  %14 = sbr.rel (!%p12_p3) target bundleno = 4 (0x4), region = 63 }
 0x183   :  { %295 = vsyncpa [#allocation3], 1 }
 0x184   :  { %297 = vsyncpa [#allocation3 + $0x1], 1 }

// kernel: tpu_custom_call.1
= control target key start
LH: loop header
LB: loop body
LE: loop exit
PB: predicated region body
PF: predicated region fallthrough
CT: control target
= control target key end

     0   :  { %7 = vsyncpa [#allocation3], 0  ;;  %s684_s0 = inlined_call_operand.vmem [shape: f32[16,16], index: 0, kind: input, shape index: {}]   ;;  %s685_s1 = inlined_call_operand.vmem [shape: f32[64,32], index: 1, kind: input, shape index: {}]   ;;  %s686_s2 = inlined_call_operand.hbm [shape: f32[16,32], index: 2, kind: output, shape index: {}]  }
   0x1   :  { %9 = vsyncpa [#allocation3 + $0x1], 0  ;;  %s547_s9 = smov 0   ;;  %s549_s10 = smov 0  }
   0x2   :  { %s551_s11 = smov 0   ;;  %s553_s12 = smov 0  }
   0x3   :  { %s555_s13 = smov 0   ;;  %s557_s14 = smov 0  }
   0x4 LB: > { %s345_s15 = sadd.s32 4294967295, %s524_s14   ;;  %s346_s16 = sadd.s32 4294967294, %s524_s14   ;;  %s524_s14 = sphi %s557_s14, %s15_s14   ;;  %s520_s13 = sphi %s555_s13, %s693_s13   ;;  %s516_s12 = sphi %s553_s12, %s692_s12   ;;  %s512_s11 = sphi %s551_s11, %s691_s11   ;;  %s508_s10 = sphi %s549_s10, %s690_s10   ;;  %s504_s9 = sphi %s547_s9, %s689_s9  }
   0x5   : > { %s27_s17 = sadd.s32 1, %s520_s13  ;;  %s83_s18 = sadd.s32 1, %s512_s11 }
   0x6   : > { %p29_p0 = scmp.ge.s32.totalorder %s27_s17, 2  ;;  %p93_p1 = scmp.ne.s32.totalorder %s512_s11, %s508_s10 }
   0x7   : > { %p94_p2 = scmp.eq.s32.totalorder %s345_s15, 1  ;;  %p99_p3 = scmp.ne.s32.totalorder %s508_s10, %s504_s9 }
   0x8   : > { %s695_s17 = smov (%p29_p0, %s27_s17), 0  ;;  %p100_p5 = scmp.eq.s32.totalorder %s346_s16, 1 }
   0x9   : > { %p587_p4 = por %p94_p2, %p93_p1  ;;  %s78_s20 = ssub.s32 %s520_s13, %s695_s17 }
   0xa   : > { %p349_p6 = scmp.ge.s32.totalorder %s524_s14, 1  ;;  %p81_p7 = scmp.eq.s32.totalorder %s78_s20, 0 }
   0xb   : > { %p594_p8 = por %p100_p5, %p99_p3  ;;  %p128_p9 = scmp.lt.s32.totalorder %s524_s14, 3 }
   0xc   : > { %s600_s22 = scalar_select %p81_p7, %s512_s11, %s83_s18  }
   0xd   : > { %p129_p10 = pnand %p349_p6, %p128_p9 }
   0xe   : > { %p149_p11 = scmp.lt.s32.totalorder (!%p129_p10), %s516_s12, 1  ;;  %s528_s26 = smov (!%p129_p10), 16  }
   0xf   : > { %132 = sbr.rel (%p129_p10) target bundleno = 372 (0x174), region = 28  ;;  %s530_s28 = smov (!%p129_p10), 48  }
  0x10   : > { %s146_s29 = sand.u32 (!%p129_p10), 1, %s508_s10   ;;  %s355_s3 = sshll.u32 (!%p129_p10), %s516_s12, 7 }
  0x11   : > { %s637_s8 = scalar_lea.hbm (!%p129_p10), %s686_s2, %s355_s3  ;;  %s263_s15 = scalar_lea.sflag (!%p129_p10), [#allocation3], %s146_s29 }
  0x14   : > { %v186_v0 = vld [vmem:[%s685_s1 + $0x38] sm:$0xff]  ;;  %v526_v1 = vmov 0.0   ;;  %v185_v2 = vld [vmem:[%s685_s1 + $0x30] sm:$0xff]  ;;  %s150_s27 = scalar_select %p149_p11, %s516_s12, 1  ;;  %v184_v3 = vld [vmem:[%s685_s1 + $0x28] sm:$0xff]  ;;  %vm527_vm0 = vmmov 0  }
  0x15   : > { %367 = vmatprep.subr.mxu0 %v526_v1  ;;  %v183_v5 = vld [vmem:[%s685_s1 + $0x20] sm:$0xff]  ;;  %v182_v6 = vld [vmem:[%s685_s1 + $0x18] sm:$0xff]  ;;  %v181_v7 = vld [vmem:[%s685_s1 + $0x10] sm:$0xff]  ;;  %383 = vmatprep.mubr.msk.f32.mxu0 %vm527_vm0, %v526_v1  ;;  %vm173_vm1 = vcmask 130048   ;;  %vm175_vm2 = vcmask 261120   ;;  %vm177_vm3 = vcmask 392192  }
  0x16   : > { %368 = vmatpush3.msra.mxu0 %v186_v0  ;;  %s351_s30 = sshll.u32 %s150_s27, 3  ;;  %v180_v8 = vld [vmem:[%s685_s1 + $0x8] sm:$0xff]  ;;  %v179_v9 = vld [vmem:[%s685_s1] sm:$0xff]  ;;  %s529_s27 = smov 32   ;;  %vm187_vm4 = vcmask 523264  }
  0x17   : > { %369 = vmatprep.subr.mxu0 %v526_v1  ;;  %s152_s5 = scalar_lea.vmem %s684_s0, %s351_s30  ;;  %s350_s30 = sshll.u32 %s146_s29, 3 }
  0x18   : > { %370 = vmatpush3.msra.mxu0 %v185_v2  ;;  %v153_v4 = vld [vmem:[%s152_s5] sm:$0xff]  ;;  %s148_s4 = scalar_lea.vmem [#allocation2], %s350_s30  ;;  %s531_s12 = smov [#allocation2]  }
  0x19   : > { %371 = vmatprep.subr.mxu0 %v526_v1  ;;  %446 = vtanh.f32 %v153_v4  ;;  %s277_s5 = sshll.u32 %s148_s4, 4  ;;  %s452_s18 = sshll.u32 %s531_s12, 4  ;;  %s639_s5 = int_to_ptr.vmem [resolvable:$true] %s277_s5  ;;  %s453_s18 = int_to_ptr.vmem [resolvable:$false] %s452_s18 }
  0x1a   : > { %372 = vmatpush3.msra.mxu0 %v184_v3  ;;  %s448_s16 = scalar_lea.vmem %s639_s5, 128  ;;  %s454_s20 = scalar_lea.vmem %s453_s18, 256 }
  0x1b   : > { %373 = vmatprep.subr.mxu0 %v526_v1  ;;  %p449_p12 = scmp.ne.s32.totalorder %s639_s5, %s448_s16  ;;  %p455_p1 = scmp.lt.s32.totalorder %s639_s5, %s453_s18 }
  0x1c   : > { %374 = vmatpush3.msra.mxu0 %v183_v5  ;;  %p456_p2 = scmp.lt.s32.totalorder %s454_s20, %s448_s16 }
  0x1d   : > { %375 = vmatprep.subr.mxu0 %v526_v1  ;;  %p450_p13 = pnand %p449_p12, %p587_p4 }
  0x1e   : > { %376 = vmatpush3.msra.mxu0 %v182_v6  ;;  %p457_p3 = por %p456_p2, %p455_p1 }
  0x1f   : > { %377 = vmatprep.subr.mxu0 %v526_v1  ;;  %p451_p0 = pneg %p450_p13 }
  0x20   : > { %378 = vmatpush3.msra.mxu0 %v181_v7 }
  0x21   : > { %379 = vmatprep.subr.mxu0 %v526_v1  ;;  %p458_p5 = pnand %p457_p3, %p451_p0 }
  0x22   : > { %380 = vmatpush3.msra.mxu0 %v180_v8 }
  0x23   : > { %381 = vmatprep.subr.mxu0 %v526_v1 }
  0x24   : > { %382 = vmatpush3.msra.mxu0 %v179_v9 }
  0x26   : > { %v447_v10 = vpop.eup %446 }
  0x27   : > { %v155_v11 = vmul.f32 2.0, %v447_v10 }
  0x29   : > { %162 = vrot.lane.b32.xlu0 %v155_v11, %s528_s26  ;;  %v156_v12 = vmul.f32 %v155_v11, %v155_v11  ;;  %v159_v14 = vmul.f32 4.0, %v155_v11 }
  0x2b   : > { %v352_v13 = vadd.f32 -2.0, %v156_v12 }
  0x2d   : > { %166 = vrot.lane.b32.xlu0 %v352_v13, %s529_s27  ;;  %v158_v15 = vmul.f32 %v352_v13, %v155_v11 }
  0x2f   : > { %v160_v16 = vsub.f32 %v158_v15, %v159_v14 }
  0x31   : > { %170 = vrot.lane.b32.xlu1 %v160_v16, %s530_s28 }
  0x9b   : > { %v163_v17 = vpop.permute.xlu0 %162 }
  0x9c   : > { %v174_v18 = vsel %vm173_vm1, 1.0, %v163_v17 }
  0x9f   : > { %v167_v19 = vpop.permute.xlu0 %166 }
  0xa0   : > { %v176_v20 = vsel %vm175_vm2, %v174_v18, %v167_v19 }
  0xa3   : > { %v171_v21 = vpop.permute.xlu1 %170 }
  0xa4   : > { %v178_v22 = vsel %vm177_vm3, %v176_v20, %v171_v21 }
  0xa5   : > { %384 = vmatmul.mubr.msk.f32.vlgmr.msra.gmra.mxu0 %vm187_vm4, %v178_v22 }
 0x165   : > { %v257_v23 = vpop.f32.mrf.mxu0 }
 0x166   : > { %261 = vst.msk [vmem:[%s148_s4] sm:$0xff] %vm175_vm2, %v257_v23 }
 0x167   : > { %v385_v24 = vpop.f32.mrf.mxu0 }
 0x168   : > { %461 = shalt.err (!%p458_p5)
}
 0x169   : > { %s462_s23 = scalar_lea.hbm %s637_s8, 128  ;;  %s466_s26 = scalar_lea.hbm %s686_s2, 256 }
 0x16a   : > { %p463_p6 = scmp.ne.s32.totalorder %s637_s8, %s462_s23  ;;  %p467_p10 = scmp.lt.s32.totalorder %s637_s8, %s686_s2 }
 0x16b   : > { %p468_p11 = scmp.lt.s32.totalorder %s466_s26, %s462_s23 }
 0x16c   : > { %p464_p7 = pnand %p463_p6, %p587_p4 }
 0x16d   : > { %p469_p12 = por %p468_p11, %p467_p10 }
 0x16e   : > { %p465_p9 = pneg %p464_p7 }
 0x170   : > { %p470_p13 = pnand %p469_p12, %p465_p9 }
 0x172   : > { %473 = shalt.err (!%p470_p13)
}
 0x173   : > { %386 = dma.vmem_to_hbm [thread:$0]  (%p587_p4), %s639_s5, 128, %s637_s8, %s263_s15  }
 0x174 PF: > { %p392_p0 = scmp.ge.s32.totalorder %s524_s14, 2  ;;  %s289_s29 = sand.u32 1, %s504_s9  }
 0x175   : > { %s290_s30 = scalar_lea.sflag [#allocation3], %s289_s29 }
 0x176   : > { %p389_p1 = pnand %p392_p0, %p594_p8 }
 0x178   : > { %p390_p2 = pneg %p389_p1 }
 0x17a   : > { %499 = dma.done.wait (%p390_p2), %s290_s30, 128  }
 0x17b   : > { %501 = vsyncadd (%p390_p2), %s290_s30, 4294967168  ;;  %s15_s14 = sadd.s32 1, %s524_s14   ;;  %s689_s9 = smov %s508_s10 }
 0x17c   : > { %p12_p3 = scmp.ge.s32.totalorder %s15_s14, 4   ;;  %s690_s10 = smov %s512_s11 }
 0x17d   : > { %s691_s11 = smov %s600_s22  ;;  %s692_s12 = smov %s520_s13 }
 0x17e   : > { %s693_s13 = smov %s695_s17  ;;  %14 = sbr.rel (!%p12_p3) target bundleno = 4 (0x4), region = 63 }
 0x183   :  { %295 = vsyncpa [#allocation3], 1 }
 0x184   :  { %297 = vsyncpa [#allocation3 + $0x1], 1 }

</bundles_post_ra>
